<compile_context>
chip_gen: v5e
topology: v5e:2x2
jax: 0.10.0
libtpu: 0.0.40
codegen_flags: <defaults>
</compile_context>

<pallas_src>
from functools import partial

import numpy as np
import jax
import jax.numpy as jnp
from jax import lax
from jax.experimental import pallas as pl
from jax.experimental.pallas import tpu as pltpu


# -----------------------------------------------------------------------------
# Pallas kernel: everything touching the (TM, 2B) similarity tile.
# -----------------------------------------------------------------------------
def _group_isogclr_kernel(feat_rows_ref, feat_full_ref, feat_pos_ref,
                          tau_ref, s_ref, gw_ref, out_ref,
                          *, gamma_eff, rho, inv_num_neg):
    TM = feat_rows_ref.shape[0]          # rows handled by this grid step
    TB = feat_full_ref.shape[0]          # 2 * batch
    B = TB // 2

    frows = feat_rows_ref[...]           # (TM, D) bf16
    ffull = feat_full_ref[...]           # (TB, D) bf16 (resident across steps)
    fpos = feat_pos_ref[...]             # (TM, D) bf16, rows (r + B) mod 2B

    # Similarity tile on the MXU: bf16 inputs, f32 accumulate, contract dim 1
    # of both operands (no transpose of the (TB, D) feature block).
    sim = lax.dot_general(
        frows, ffull,
        dimension_numbers=(((1,), (1,)), ((), ())),
        preferred_element_type=jnp.float32)                       # (TM, TB) f32

    # Positive-pair similarity: row-wise dot with the rolled partner tile
    # (replaces diagonal extraction / positive mask).  f32 elementwise.
    pos_sim = jnp.sum(frows.astype(jnp.float32) * fpos.astype(jnp.float32),
                      axis=1, keepdims=True)                      # (TM, 1)

    tau_rows = tau_ref[...]                                       # (TM, 1) f32
    inv_tau = 1.0 / tau_rows        # TM scalars only; exact (feeds an exponent)

    e = jnp.exp(sim * inv_tau)                                    # (TM, TB) EUP

    # Negative mask (1 - eye(B)).repeat(2,2): drop columns with c % B == r % B.
    i = pl.program_id(0)
    row_g = i * TM + lax.broadcasted_iota(jnp.int32, (TM, 1), 0)
    col = lax.broadcasted_iota(jnp.int32, (1, TB), 1)
    row_mod = jnp.where(row_g >= B, row_g - B, row_g)
    col_mod = jnp.where(col >= B, col - B, col)
    e = jnp.where(row_mod != col_mod, e, 0.0)                     # (TM, TB)

    sum_e = jnp.sum(e, axis=1, keepdims=True)                     # (TM, 1) XLU
    sum_es = jnp.sum(e * sim, axis=1, keepdims=True)              # (TM, 1) XLU

    g = sum_e * inv_num_neg                                       # (TM, 1)
    s_row = (1.0 - gamma_eff) * s_ref[...] + gamma_eff * g        # (TM, 1)
    inv_s = pl.reciprocal(s_row, approx=True)                     # EUP

    # loss_row = group_weight * sum(w * sim) / num_neg - pos_sim, with
    # w = e / s hoisted:  gw * inv_s * (sum(e*sim) * inv_num_neg).
    loss_row = gw_ref[...] * inv_s * (sum_es * inv_num_neg) - pos_sim
    f_row = tau_rows * (jnp.log(s_row) + rho)                     # F1/F2 rows

    # Lane-dense packed output: col 0 = loss, col 1 = s, col 2 = F, rest 0.
    # Full 128-lane unmasked stores (avoids narrow masked vst.msk).
    lane = lax.broadcasted_iota(jnp.int32, (TM, 128), 1)
    out_ref[...] = jnp.where(lane == 0, loss_row,
                   jnp.where(lane == 1, s_row,
                   jnp.where(lane == 2, f_row, 0.0)))


def _pick_tm(B, cap=256):
    """Largest multiple-of-8 divisor of B that is <= cap (256 fills the v6e MXU)."""
    best = 8
    for t in range(8, min(B, cap) + 1, 8):
        if B % t == 0:
            best = t
    return best


def _call_group_isogclr_kernel(contrast_bf16, tau_rows, s_rows, gw_rows,
                               *, gamma_eff, rho, block_rows=None):
    TB, D = contrast_bf16.shape
    B = TB // 2
    assert B % 8 == 0, "batch size must be a multiple of 8"
    TM = block_rows if block_rows is not None else _pick_tm(B)
    assert B % TM == 0
    n_half = B // TM
    n_tiles = TB // TM
    inv_num_neg = 1.0 / float(2 * B - 2)

    kernel = partial(_group_isogclr_kernel,
                     gamma_eff=float(gamma_eff), rho=float(rho),
                     inv_num_neg=inv_num_neg)

    # VMEM budget: resident bf16 features + (TM, TB) f32 temporaries + buffers.
    est = (2 * TB * D * 2            # resident contrast (bf16), worst-case 2 bufs
           + 4 * TM * D * 2          # row + partner tiles, double-buffered
           + 6 * TM * TB * 4         # live f32 tile temporaries
           + 2 * TM * 128 * 4        # packed output block, double-buffered
           + 12 * TM * 4)            # per-row columns
    vmem_limit = int(min(max(2 * est, 32 * 1024 * 1024), 64 * 1024 * 1024))

    out = pl.pallas_call(
        kernel,
        out_shape=jax.ShapeDtypeStruct((TB, 128), jnp.float32),
        grid=(n_tiles,),
        in_specs=[
            pl.BlockSpec((TM, D), lambda i: (i, 0)),                          # row tile
            pl.BlockSpec((TB, D), lambda i: (0, 0)),                          # full, resident
            pl.BlockSpec((TM, D), lambda i: ((i + n_half) % n_tiles, 0)),     # +B partner tile
            pl.BlockSpec((TM, 1), lambda i: (i, 0)),                          # tau rows
            pl.BlockSpec((TM, 1), lambda i: (i, 0)),                          # s rows
            pl.BlockSpec((TM, 1), lambda i: (i, 0)),                          # group weight rows
        ],
        out_specs=pl.BlockSpec((TM, 128), lambda i: (i, 0)),
        compiler_params=pltpu.CompilerParams(
            dimension_semantics=("parallel",),
            vmem_limit_bytes=vmem_limit),
    )(contrast_bf16, contrast_bf16, contrast_bf16, tau_rows, s_rows, gw_rows)
    # TODO(synk): for very large 2B (>~8K) add an inner "arbitrary" column-tile
    # axis with running-sum scratch so per-step VMEM stays TM x TN.

    loss_row = out[:, 0]
    s_row = out[:, 1]
    f_row = out[:, 2]
    return loss_row, s_row, f_row


# -----------------------------------------------------------------------------
# Stateful wrapper mirroring the PyTorch module (state kept as jnp arrays).
# -----------------------------------------------------------------------------
class GroupISogCLRLoss:
    def __init__(self, taus, group_info, eta_p, lambada, num_groups, rho,
                 N=15000000, gamma=0.8, bsz=256):
        self.taus = jnp.asarray(taus, jnp.float32)
        # group_info_dict (python dict idx -> group id) becomes an int32 lookup table.
        if isinstance(group_info, dict):
            gi = np.zeros(N, np.int32)
            for k, v in group_info.items():
                gi[k] = v
            group_info = gi
        self.group_info = jnp.asarray(group_info, jnp.int32)
        self.num_groups = num_groups
        self.eta_p = eta_p
        self.lambada = lambada
        self.gamma = gamma
        self.rho = rho
        self.s = jnp.zeros(N, jnp.float32)
        self.p = jnp.ones(num_groups, jnp.float32) / num_groups
        self.z = jnp.zeros(num_groups, jnp.float32)
        self.eps = 1e-8
        self.grad_clip = 3.0

    def forward(self, index, features, epoch, max_epoch):
        B = features.shape[0]
        assert B % 8 == 0, "batch size must be a multiple of 8 for TPU tiling"
        TB = 2 * B

        # contrast_feature = cat(unbind(features, 1), 0); kept bf16 for the MXU.
        feats_bf16 = features.astype(jnp.bfloat16)
        contrast = jnp.concatenate([feats_bf16[:, 0, :], feats_bf16[:, 1, :]], axis=0)

        index = jnp.asarray(index, jnp.int32)
        tau_idx = self.taus[index]                         # (B,)
        s_idx = self.s[index]                              # (B,)
        group_ids = self.group_info[index]                 # (B,)
        group_weight = self.num_groups * self.p[group_ids] # (B,)

        def rep2col(x):  # x repeated for both views, as a (2B, 1) f32 column
            return jnp.concatenate([x, x]).reshape(TB, 1).astype(jnp.float32)

        # epoch == 0 branch (s = g) implemented as gamma_eff = 1.
        gamma_eff = 1.0 if int(epoch) == 0 else self.gamma

        loss_row, s_row, f_row = _call_group_isogclr_kernel(
            contrast, rep2col(tau_idx), rep2col(s_idx), rep2col(group_weight),
            gamma_eff=gamma_eff, rho=self.rho)

        s1, s2 = s_row[:B], s_row[B:]
        loss = (loss_row[:B] + loss_row[B:]).reshape(B, 1)
        self.s = self.s.at[index].set((s1 + s2) / 2.0)

        F1, F2 = f_row[:B], f_row[B:]
        onehot = jax.nn.one_hot(group_ids, self.num_groups, dtype=jnp.float32)
        group_counts = onehot.sum(axis=0)
        # TODO(synk): the PyTorch spec writes F1[None, :], which only broadcasts
        # when bsz == num_groups; implementing the intended per-group mean.
        grad_p_1 = (onehot * F1[:, None]).sum(axis=0) / group_counts
        grad_p_2 = (onehot * F2[:, None]).sum(axis=0) / group_counts
        self.z = (1.0 - self.gamma) * self.z + self.gamma * (grad_p_1 + grad_p_2) / 2.0

        grad_hp = -self.lambada * jnp.log(self.p + self.eps) - self.lambada
        new_p = self.p * jnp.exp(
            2.0 * self.eta_p * jnp.clip(self.z + grad_hp, -self.grad_clip, self.grad_clip))
        self.p = new_p / new_p.sum()
        return loss, self.p


# -----------------------------------------------------------------------------
# Pure-JAX reference (direct port of the torch forward) for verification.
# -----------------------------------------------------------------------------
def _reference_forward(taus, group_info, s, p, z, index, features,
                       gamma, rho, eta_p, lambada, num_groups, epoch,
                       eps=1e-8, grad_clip=3.0):
    B = features.shape[0]
    feats = features.astype(jnp.bfloat16).astype(jnp.float32)  # same rounding as kernel input
    cf = jnp.concatenate([feats[:, 0], feats[:, 1]], 0)
    sim = cf @ cf.T
    pos_sim = jnp.concatenate([jnp.diagonal(sim, offset=B),
                               jnp.diagonal(sim, offset=-B)])[:, None]
    tau = jnp.concatenate([taus[index], taus[index]])
    sim_d = sim / tau[:, None]
    mask = jnp.tile(1.0 - jnp.eye(B, dtype=jnp.float32), (2, 2))
    expm = jnp.exp(sim_d) * mask
    num_neg = 2 * B - 2
    g = expm.sum(1, keepdims=True) / num_neg
    if epoch == 0:
        s1, s2 = g[:, 0][:B], g[:, 0][B:]
    else:
        s1 = (1.0 - gamma) * s[index] + gamma * g[:, 0][:B]
        s2 = (1.0 - gamma) * s[index] + gamma * g[:, 0][B:]
    s_new = (s1 + s2) / 2.0
    gids = group_info[index]
    gw = num_groups * p[gids]
    w1 = expm[:B] / s1[:, None]
    w2 = expm[B:] / s2[:, None]
    loss1 = (w1 * gw[:, None] * sim[:B]).sum(1, keepdims=True) / num_neg - pos_sim[:B]
    loss2 = (w2 * gw[:, None] * sim[B:]).sum(1, keepdims=True) / num_neg - pos_sim[B:]
    loss = loss1 + loss2
    F1 = taus[index] * (jnp.log(s1) + rho)
    F2 = taus[index] * (jnp.log(s2) + rho)
    onehot = jax.nn.one_hot(gids, num_groups, dtype=jnp.float32)
    counts = onehot.sum(0)
    gp1 = (onehot * F1[:, None]).sum(0) / counts
    gp2 = (onehot * F2[:, None]).sum(0) / counts
    z_new = (1.0 - gamma) * z + gamma * (gp1 + gp2) / 2.0
    grad_hp = -lambada * jnp.log(p + eps) - lambada
    new_p = p * jnp.exp(2.0 * eta_p * jnp.clip(z_new + grad_hp, -grad_clip, grad_clip))
    return loss, new_p / new_p.sum(), s_new


if __name__ == "__main__":
    key = jax.random.PRNGKey(0)
    B, V, D = 64, 2, 64
    N, G = 256, 4

    k1, k2, k3 = jax.random.split(key, 3)
    feats = jax.random.normal(k1, (B, V, D), dtype=jnp.float32)
    feats = feats / jnp.linalg.norm(feats, axis=-1, keepdims=True)

    # deterministic unique indices that cover every group at least once
    group_info = jnp.arange(N, dtype=jnp.int32) % G
    rest = (jax.random.permutation(k2, N - G)[: B - G] + G).astype(jnp.int32)
    index = jnp.concatenate([jnp.arange(G, dtype=jnp.int32), rest])

    taus = 0.1 + 0.6 * jax.random.uniform(k3, (N,), dtype=jnp.float32)

    mod = GroupISogCLRLoss(taus=taus, group_info=group_info, eta_p=0.01,
                           lambada=1.0, num_groups=G, rho=6.0,
                           N=N, gamma=0.8, bsz=B)
    s0, p0, z0 = mod.s, mod.p, mod.z

    loss, p = mod.forward(index, feats, epoch=1, max_epoch=10)
    jax.block_until_ready((loss, p, mod.s, mod.z))

    ref_loss, ref_p, ref_s_new = _reference_forward(
        taus, group_info, s0, p0, z0, index, feats,
        gamma=mod.gamma, rho=mod.rho, eta_p=mod.eta_p, lambada=mod.lambada,
        num_groups=G, epoch=1)

    assert loss.shape == (B, 1)
    assert bool(jnp.all(jnp.isfinite(loss))) and bool(jnp.all(jnp.isfinite(p)))
    assert jnp.allclose(loss, ref_loss, rtol=2e-2, atol=2e-2), (loss[:4, 0], ref_loss[:4, 0])
    assert jnp.allclose(p, ref_p, rtol=1e-3, atol=1e-5), (p, ref_p)
    assert jnp.allclose(mod.s[index], ref_s_new, rtol=1e-3, atol=1e-5)
    print("KERNEL_OK")
</pallas_src>

<mosaic_0001>
module attributes {stable_mosaic.version = 11 : i64} {
  func.func @_group_isogclr_kernel(%arg0: i32, %arg1: memref<64x64xbf16, #tpu.memory_space<vmem>>, %arg2: memref<128x64xbf16, #tpu.memory_space<vmem>>, %arg3: memref<64x64xbf16, #tpu.memory_space<vmem>>, %arg4: memref<64x1xf32, #tpu.memory_space<vmem>>, %arg5: memref<64x1xf32, #tpu.memory_space<vmem>>, %arg6: memref<64x1xf32, #tpu.memory_space<vmem>>, %arg7: memref<64x128xf32, #tpu.memory_space<vmem>>) attributes {dimension_semantics = [#tpu.dimension_semantics<parallel>], iteration_bounds = array<i64: 2>, scalar_prefetch = 0 : i64, scratch_operands = 0 : i64, tpu.core_type = #tpu.core_type<tc>, window_params = [{transform_indices = @transform_0, window_bounds = array<i64: 64, 64>}, {pipeline_mode = #tpu.pipeline_mode<synchronous>, transform_indices = @transform_1, window_bounds = array<i64: 128, 64>}, {transform_indices = @transform_2, window_bounds = array<i64: 64, 64>}, {transform_indices = @transform_3, window_bounds = array<i64: 64, 1>}, {transform_indices = @transform_4, window_bounds = array<i64: 64, 1>}, {transform_indices = @transform_5, window_bounds = array<i64: 64, 1>}, {transform_indices = @transform_6, window_bounds = array<i64: 64, 128>}]} {
    %c0 = arith.constant 0 : index
    %c0_0 = arith.constant 0 : index
    %0 = vector.load %arg1[%c0, %c0_0] : memref<64x64xbf16, #tpu.memory_space<vmem>>, vector<64x64xbf16>
    %c0_1 = arith.constant 0 : index
    %c0_2 = arith.constant 0 : index
    %1 = vector.load %arg2[%c0_1, %c0_2] : memref<128x64xbf16, #tpu.memory_space<vmem>>, vector<128x64xbf16>
    %c0_3 = arith.constant 0 : index
    %c0_4 = arith.constant 0 : index
    %2 = vector.load %arg3[%c0_3, %c0_4] : memref<64x64xbf16, #tpu.memory_space<vmem>>, vector<64x64xbf16>
    %cst = arith.constant dense<0.000000e+00> : vector<64x128xf32>
    %3 = tpu.matmul %0, %1, %cst {dimension_numbers = #tpu.dot_dimension_numbers<[1], [1], [0], [0], [0, 0, 1, 0], [], []>} : vector<64x64xbf16>, vector<128x64xbf16>, vector<64x128xf32> -> vector<64x128xf32>
    %4 = arith.extf %0 : vector<64x64xbf16> to vector<64x64xf32>
    %5 = arith.extf %2 : vector<64x64xbf16> to vector<64x64xf32>
    %6 = arith.mulf %4, %5 : vector<64x64xf32>
    %cst_5 = arith.constant dense<0.000000e+00> : vector<64xf32>
    %7 = vector.multi_reduction <add>, %6, %cst_5 [1] : vector<64x64xf32> to vector<64xf32>
    %8 = vector.shape_cast %7 : vector<64xf32> to vector<64x1xf32>
    %c0_6 = arith.constant 0 : index
    %c0_7 = arith.constant 0 : index
    %9 = vector.load %arg4[%c0_6, %c0_7] : memref<64x1xf32, #tpu.memory_space<vmem>>, vector<64x1xf32>
    %cst_8 = arith.constant 1.000000e+00 : f32
    %10 = vector.broadcast %cst_8 : f32 to vector<64x1xf32>
    %11 = arith.divf %10, %9 : vector<64x1xf32>
    %12 = vector.broadcast %11 : vector<64x1xf32> to vector<64x128xf32>
    %13 = arith.mulf %3, %12 : vector<64x128xf32>
    %14 = math.exp %13 : vector<64x128xf32>
    %c64_i32 = arith.constant 64 : i32
    %15 = arith.muli %arg0, %c64_i32 : i32
    %16 = tpu.iota {dimensions = array<i32: 0>} : vector<64x1xi32>
    %17 = vector.broadcast %15 : i32 to vector<64x1xi32>
    %18 = arith.addi %17, %16 : vector<64x1xi32>
    %19 = tpu.iota {dimensions = array<i32: 1>} : vector<1x128xi32>
    %c64_i32_9 = arith.constant 64 : i32
    %20 = vector.broadcast %c64_i32_9 : i32 to vector<64x1xi32>
    %21 = arith.cmpi sge, %18, %20 : vector<64x1xi32>
    %c64_i32_10 = arith.constant 64 : i32
    %22 = vector.broadcast %c64_i32_10 : i32 to vector<64x1xi32>
    %23 = arith.subi %18, %22 : vector<64x1xi32>
    %24 = arith.select %21, %23, %18 : vector<64x1xi1>, vector<64x1xi32>
    %c64_i32_11 = arith.constant 64 : i32
    %25 = vector.broadcast %c64_i32_11 : i32 to vector<1x128xi32>
    %26 = arith.cmpi sge, %19, %25 : vector<1x128xi32>
    %c64_i32_12 = arith.constant 64 : i32
    %27 = vector.broadcast %c64_i32_12 : i32 to vector<1x128xi32>
    %28 = arith.subi %19, %27 : vector<1x128xi32>
    %29 = arith.select %26, %28, %19 : vector<1x128xi1>, vector<1x128xi32>
    %30 = vector.broadcast %24 : vector<64x1xi32> to vector<64x128xi32>
    %31 = vector.broadcast %29 : vector<1x128xi32> to vector<64x128xi32>
    %32 = arith.cmpi ne, %30, %31 : vector<64x128xi32>
    %cst_13 = arith.constant 0.000000e+00 : f32
    %33 = vector.broadcast %cst_13 : f32 to vector<64x128xf32>
    %34 = arith.select %32, %14, %33 : vector<64x128xi1>, vector<64x128xf32>
    %cst_14 = arith.constant dense<0.000000e+00> : vector<64xf32>
    %35 = vector.multi_reduction <add>, %34, %cst_14 [1] : vector<64x128xf32> to vector<64xf32>
    %36 = vector.shape_cast %35 : vector<64xf32> to vector<64x1xf32>
    %37 = arith.mulf %34, %3 : vector<64x128xf32>
    %cst_15 = arith.constant dense<0.000000e+00> : vector<64xf32>
    %38 = vector.multi_reduction <add>, %37, %cst_15 [1] : vector<64x128xf32> to vector<64xf32>
    %39 = vector.shape_cast %38 : vector<64xf32> to vector<64x1xf32>
    %cst_16 = arith.constant 0.00793650839 : f32
    %40 = vector.broadcast %cst_16 : f32 to vector<64x1xf32>
    %41 = arith.mulf %36, %40 : vector<64x1xf32>
    %c0_17 = arith.constant 0 : index
    %c0_18 = arith.constant 0 : index
    %42 = vector.load %arg5[%c0_17, %c0_18] : memref<64x1xf32, #tpu.memory_space<vmem>>, vector<64x1xf32>
    %cst_19 = arith.constant 2.000000e-01 : f32
    %43 = vector.broadcast %cst_19 : f32 to vector<64x1xf32>
    %44 = arith.mulf %43, %42 : vector<64x1xf32>
    %cst_20 = arith.constant 8.000000e-01 : f32
    %45 = vector.broadcast %cst_20 : f32 to vector<64x1xf32>
    %46 = arith.mulf %45, %41 : vector<64x1xf32>
    %47 = arith.addf %44, %46 : vector<64x1xf32>
    %48 = tpu.reciprocal %47 {approx = true} : vector<64x1xf32> -> vector<64x1xf32>
    %c0_21 = arith.constant 0 : index
    %c0_22 = arith.constant 0 : index
    %49 = vector.load %arg6[%c0_21, %c0_22] : memref<64x1xf32, #tpu.memory_space<vmem>>, vector<64x1xf32>
    %50 = arith.mulf %49, %48 : vector<64x1xf32>
    %cst_23 = arith.constant 0.00793650839 : f32
    %51 = vector.broadcast %cst_23 : f32 to vector<64x1xf32>
    %52 = arith.mulf %39, %51 : vector<64x1xf32>
    %53 = arith.mulf %50, %52 : vector<64x1xf32>
    %54 = arith.subf %53, %8 : vector<64x1xf32>
    %55 = math.log %47 : vector<64x1xf32>
    %cst_24 = arith.constant 6.000000e+00 : f32
    %56 = vector.broadcast %cst_24 : f32 to vector<64x1xf32>
    %57 = arith.addf %55, %56 : vector<64x1xf32>
    %58 = arith.mulf %9, %57 : vector<64x1xf32>
    %59 = tpu.iota {dimensions = array<i32: 1>} : vector<64x128xi32>
    %c0_i32 = arith.constant 0 : i32
    %60 = vector.broadcast %c0_i32 : i32 to vector<64x128xi32>
    %61 = arith.cmpi eq, %59, %60 : vector<64x128xi32>
    %c1_i32 = arith.constant 1 : i32
    %62 = vector.broadcast %c1_i32 : i32 to vector<64x128xi32>
    %63 = arith.cmpi eq, %59, %62 : vector<64x128xi32>
    %c2_i32 = arith.constant 2 : i32
    %64 = vector.broadcast %c2_i32 : i32 to vector<64x128xi32>
    %65 = arith.cmpi eq, %59, %64 : vector<64x128xi32>
    %cst_25 = arith.constant 0.000000e+00 : f32
    %66 = vector.shape_cast %58 : vector<64x1xf32> to vector<64x1xf32>
    %67 = vector.broadcast %66 : vector<64x1xf32> to vector<64x128xf32>
    %68 = vector.broadcast %cst_25 : f32 to vector<64x128xf32>
    %69 = arith.select %65, %67, %68 : vector<64x128xi1>, vector<64x128xf32>
    %70 = vector.shape_cast %47 : vector<64x1xf32> to vector<64x1xf32>
    %71 = vector.broadcast %70 : vector<64x1xf32> to vector<64x128xf32>
    %72 = arith.select %63, %71, %69 : vector<64x128xi1>, vector<64x128xf32>
    %73 = vector.shape_cast %54 : vector<64x1xf32> to vector<64x1xf32>
    %74 = vector.broadcast %73 : vector<64x1xf32> to vector<64x128xf32>
    %75 = arith.select %61, %74, %72 : vector<64x128xi1>, vector<64x128xf32>
    %c0_26 = arith.constant 0 : index
    %c0_27 = arith.constant 0 : index
    %76 = vector.load %arg7[%c0_26, %c0_27] : memref<64x128xf32, #tpu.memory_space<vmem>>, vector<64x128xf32>
    tpu.vector_store %arg7[%c0_26, %c0_27], %75 {strides = array<i32>} : memref<64x128xf32, #tpu.memory_space<vmem>>, vector<64x128xf32>,
    return
  }
  func.func @transform_0(%arg0: i32) -> (i32, i32) {
    %c0_i32 = arith.constant 0 : i32
    %c0_i32_0 = arith.constant 0 : i32
    return %arg0, %c0_i32 : i32, i32
  }
  func.func @transform_1(%arg0: i32) -> (i32, i32) {
    %c0_i32 = arith.constant 0 : i32
    %c0_i32_0 = arith.constant 0 : i32
    %c0_i32_1 = arith.constant 0 : i32
    return %c0_i32, %c0_i32_0 : i32, i32
  }
  func.func @transform_2(%arg0: i32) -> (i32, i32) {
    %c1_i32 = arith.constant 1 : i32
    %0 = arith.addi %arg0, %c1_i32 : i32
    %c2_i32 = arith.constant 2 : i32
    %c0_i32 = arith.constant 0 : i32
    %1 = arith.cmpi eq, %c2_i32, %c0_i32 : i32
    %c1_i32_0 = arith.constant 1 : i32
    %2 = arith.select %1, %c1_i32_0, %c2_i32 : i32
    %3 = arith.remsi %0, %2 : i32
    %c0_i32_1 = arith.constant 0 : i32
    %4 = arith.cmpi ne, %3, %c0_i32_1 : i32
    %c0_i32_2 = arith.constant 0 : i32
    %5 = arith.cmpi slt, %3, %c0_i32_2 : i32
    %c0_i32_3 = arith.constant 0 : i32
    %6 = arith.cmpi slt, %2, %c0_i32_3 : i32
    %7 = arith.xori %5, %6 : i1
    %8 = arith.andi %7, %4 : i1
    %9 = arith.addi %3, %2 : i32
    %10 = arith.select %8, %9, %3 : i32
    %c0_i32_4 = arith.constant 0 : i32
    %c0_i32_5 = arith.constant 0 : i32
    return %10, %c0_i32_4 : i32, i32
  }
  func.func @transform_3(%arg0: i32) -> (i32, i32) {
    %c0_i32 = arith.constant 0 : i32
    %c0_i32_0 = arith.constant 0 : i32
    return %arg0, %c0_i32 : i32, i32
  }
  func.func @transform_4(%arg0: i32) -> (i32, i32) {
    %c0_i32 = arith.constant 0 : i32
    %c0_i32_0 = arith.constant 0 : i32
    return %arg0, %c0_i32 : i32, i32
  }
  func.func @transform_5(%arg0: i32) -> (i32, i32) {
    %c0_i32 = arith.constant 0 : i32
    %c0_i32_0 = arith.constant 0 : i32
    return %arg0, %c0_i32 : i32, i32
  }
  func.func @transform_6(%arg0: i32) -> (i32, i32) {
    %c0_i32 = arith.constant 0 : i32
    %c0_i32_0 = arith.constant 0 : i32
    return %arg0, %c0_i32 : i32, i32
  }
}

</mosaic_0001>

<bundles_post_ra>
// kernel: tpu_custom_call.1
= control target key start
LH: loop header
LB: loop body
LE: loop exit
PB: predicated region body
PF: predicated region fallthrough
CT: control target
= control target key end

     0   :  { %11 = vsyncpa [#allocation3], 0  ;;  %s2246_s0 = inlined_call_operand.vmem [shape: bf16[128,64], index: 0, kind: input, shape index: {}]   ;;  %s2247_s1 = inlined_call_operand.vmem [shape: bf16[128,64], index: 1, kind: input, shape index: {}]   ;;  %s2248_s2 = inlined_call_operand.vmem [shape: bf16[128,64], index: 2, kind: input, shape index: {}]   ;;  %s2249_s3 = inlined_call_operand.vmem [shape: f32[128,1], index: 3, kind: input, shape index: {}]   ;;  %s2250_s4 = inlined_call_operand.vmem [shape: f32[128,1], index: 4, kind: input, shape index: {}]   ;;  %s2251_s5 = inlined_call_operand.vmem [shape: f32[128,1], index: 5, kind: input, shape index: {}]   ;;  %s2252_s6 = inlined_call_operand.hbm [shape: f32[128,128], index: 6, kind: output, shape index: {}]  }
   0x1   :  { %13 = vsyncpa [#allocation3 + $0x1], 0  ;;  %s1693_s21 = smov 0   ;;  %s1695_s22 = smov 0  }
   0x2   :  { %s1697_s23 = smov 0   ;;  %s1699_s24 = smov 0  }
   0x3 LB: > { %s1714_s25 = sadd.s32 4294967295, %s1653_s24   ;;  %s1335_s26 = sadd.s32 4294967294, %s1653_s24   ;;  %s1653_s24 = sphi %s1699_s24, %s2276_s24   ;;  %s1649_s23 = sphi %s1697_s23, %s2275_s23   ;;  %s1645_s22 = sphi %s1695_s22, %s2274_s22   ;;  %s1641_s21 = sphi %s1693_s21, %s2273_s21  }
   0x4   : > { %s1718_s27 = sadd.s32 1, %s1653_s24   ;;  %s203_s28 = sadd.s32 1, %s1649_s23 }
   0x5   : > { %s200_s29 = ssub.s32 %s1653_s24, %s1718_s27  ;;  %p213_p0 = scmp.ne.s32.totalorder %s1649_s23, %s1645_s22 }
   0x6   : > { %p201_p1 = scmp.eq.s32.totalorder %s200_s29, 0  ;;  %p214_p2 = scmp.eq.s32.totalorder %s1714_s25, 1 }
   0x7   : > { %p219_p3 = scmp.ne.s32.totalorder %s1645_s22, %s1641_s21  ;;  %p220_p4 = scmp.eq.s32.totalorder %s1335_s26, 1 }
   0x8   : > { %s1729_s30 = scalar_select %p201_p1, %s1649_s23, %s203_s28  }
   0x9   : > { %p1731_p5 = por %p214_p2, %p213_p0  ;;  %p1735_p6 = por %p220_p4, %p219_p3 }
   0xa   : > { %p1344_p7 = scmp.ge.s32.totalorder %s1653_s24, 1  ;;  %p312_p8 = scmp.lt.s32.totalorder %s1653_s24, 3 }
   0xc   : > { %p313_p9 = pnand %p1344_p7, %p312_p8 }
   0xd   : > { %s1346_s11 = sshll.u32 (!%p313_p9), %s1714_s25, 3  ;;  %s381_s12 = sadd.s32 (!%p313_p9), 1, %s1714_s25 }
   0xe   : > { %316 = sbr.rel (%p313_p9) target bundleno = 537 (0x219), region = 44  ;;  %p376_p10 = scmp.lt.s32.totalorder (!%p313_p9), %s1346_s11, 15 }
   0xf   : > { %p382_p11 = scmp.lt.s32.totalorder (!%p313_p9), %s381_s12, 0  ;;  %s383_s13 = ssub.s32 (!%p313_p9), 0, %s381_s12 }
  0x10   : > { %s1348_s16 = smin.u32 (!%p313_p9), %s383_s13, %s381_s12 }
  0x11   : > { %s385_s17 = sand.u32 (!%p313_p9), 1, %s1348_s16  }
  0x12   : > { %s386_s18 = ssub.s32 (!%p313_p9), 0, %s385_s17 }
  0x13   : > { %v1437_v0 = vld [vmem:[%s2247_s1 + $0x38] sm:$0xff]  ;;  %vm524_vm0 = vcmask 523264   ;;  %s2278_s11 = smov (!%p376_p10, %s1346_s11), 15  ;;  %v1436_v2 = vld [vmem:[%s2247_s1 + $0x30] sm:$0xff]  ;;  %s2280_s18 = smov (!%p382_p11, %s386_s18), %s385_s17  ;;  %v1435_v4 = vld [vmem:[%s2247_s1 + $0x28] sm:$0xff]  ;;  %v1655_v38 = vmov 0  }
  0x14   : > { %v559_v1 = vsel %vm524_vm0, %v1437_v0, 0  ;;  %v556_v3 = vsel %vm524_vm0, %v1436_v2, 0  ;;  %p1350_p12 = scmp.lt.s32.totalorder %s2280_s18, 0  ;;  %s392_s19 = sadd.s32 2, %s2280_s18  ;;  %v553_v5 = vsel %vm524_vm0, %v1435_v4, 0  ;;  %v1434_v13 = vld [vmem:[%s2247_s1 + $0x20] sm:$0xff]  ;;  %1524 = vset.pattern.permute.xlu2 %v1655_v38  ;;  %1526 = vset.pattern.permute.xlu1 %v1655_v38 }
  0x15   : > { %561 = vmatpush.bf16.xpose.msra.mxu0 %v559_v1  ;;  %1458 = vmatpush.bf16.xpose.msra.mxu1 %v559_v1  ;;  %s1347_s20 = sshll.u32 %s2278_s11, 2  ;;  %s1763_s14 = sshll.u32 %s2278_s11, 3  ;;  %v550_v25 = vsel %vm524_vm0, %v1434_v13, 0  ;;  %v1433_v35 = vld [vmem:[%s2247_s1 + $0x18] sm:$0xff]  ;;  %v1432_v52 = vld [vmem:[%s2247_s1 + $0x10] sm:$0xff]  ;;  %v1431_v0 = vld [vmem:[%s2247_s1 + $0x8] sm:$0xff] }
  0x16   : > { %1459 = vmatpush.bf16.xpose.msra.mxu2 %v559_v1  ;;  %1460 = vmatpush.bf16.xpose.msra.mxu3 %v559_v1  ;;  %s2282_s19 = smov (!%p1350_p12, %s392_s19), %s2280_s18  ;;  %s1757_s10 = scalar_lea.vmem %s2246_s0, %s1347_s20  ;;  %v547_v44 = vsel %vm524_vm0, %v1433_v35, 0  ;;  %v544_v57 = vsel %vm524_vm0, %v1432_v52, 0  ;;  %v1430_v4 = vld [vmem:[%s2247_s1] sm:$0xff] }
  0x17   : > { %s1351_s12 = sshll.u32 %s2282_s19, 3  ;;  %v436_v6 = vld [vmem:[%s1757_s10 + $0x10] sm:$0xff]   ;;  %v434_v7 = vld [vmem:[%s1757_s10 + $0x8] sm:$0xff]   ;;  %v432_v8 = vld [vmem:[%s1757_s10] sm:$0xff]   ;;  %s1780_s26 = scalar_lea.vmem %s2249_s3, %s1763_s14  ;;  %1525 = vset.pattern.permute.xlu0 %v1655_v38 }
  0x18   : > { %p395_p13 = scmp.lt.s32.totalorder %s1351_s12, 15  ;;  %v594_v9 = vunpack.c.l.bf16 %v436_v6  ;;  %v592_v10 = vunpack.c.l.bf16 %v434_v7  ;;  %v590_v14 = vunpack.c.l.bf16 %v432_v8  ;;  %v595_v18 = vunpack.c.h.bf16 %v436_v6  ;;  %v1784_v27 = vld [vmem:[%s1780_s26] sm:$0xff]  ;;  %v439_v36 = vld [vmem:[%s1757_s10 + $0x18] sm:$0xff]   ;;  %v1799_v45 = vld [vmem:[%s1780_s26 + $0x10] sm:$0xff]  ;;  %s2089_s19 = scalar_lea.vmem %s2250_s4, %s1763_s14 }
  0x19   : > { %v593_v19 = vunpack.c.h.bf16 %v434_v7  ;;  %v591_v32 = vunpack.c.h.bf16 %v432_v8  ;;  %1527 = vrcp.f32 %v1784_v27  ;;  %v597_v43 = vunpack.c.h.bf16 %v439_v36  ;;  %v1805_v50 = vld [vmem:[%s1780_s26 + $0x18] sm:$0xff]  ;;  %v1815_v54 = vld [vmem:[%s1780_s26 + $0x8] sm:$0xff]  ;;  %v1827_v62 = vld [vmem:[%s1780_s26 + $0x20] sm:$0xff]  ;;  %s2098_s28 = scalar_lea.vmem %s2251_s5, %s1763_s14  ;;  %s372_s14 = sand.u32 1, %s1645_s22  }
  0x1a   : > { %s2284_s12 = smov (!%p395_p13, %s1351_s12), 15  ;;  %v596_v49 = vunpack.c.l.bf16 %v439_v36  ;;  %1529 = vrcp.f32 %v1799_v45  ;;  %v1823_v60 = vld [vmem:[%s1780_s26 + $0x28] sm:$0xff]  ;;  %vm651_vm1 = vweird.f32 %v1784_v27  ;;  %v655_v6 = vand.u32 2147483647, %v1784_v27  ;;  %s1345_s29 = sshll.u32 %s372_s14, 6 }
  0x1b   : > { %s1352_s13 = sshll.u32 %s2284_s12, 2  ;;  %1531 = vrcp.f32 %v1805_v50  ;;  %v657_v7 = vand.u32 2147483648, %v1784_v27  ;;  %v541_v8 = vsel %vm524_vm0, %v1431_v0, 0  ;;  %vm681_vm5 = vweird.f32 %v1799_v45  ;;  %s2155_s9 = scalar_lea.vmem [#allocation2], %s1345_s29 }
  0x1c   : > { %s1768_s17 = scalar_lea.vmem %s2248_s2, %s1352_s13  ;;  %1533 = vrcp.f32 %v1815_v54  ;;  %vm1869_vm4 = vcmp.eq.f32.partialorder %v655_v6, 8.507059e+37  ;;  %vm666_vm7 = vweird.f32 %v1815_v54  ;;  %vm696_vm9 = vweird.f32 %v1805_v50  ;;  %v1429_v6 = vld [vmem:[%s1757_s10 + $0x18] sm:$0xff]  ;;  %s1611_s20 = scalar_lea.hbm %s2252_s6, 128 }
  0x1d   : > { %562 = vmatpush.bf16.xpose.msra.mxu0 %v556_v3  ;;  %1461 = vmatpush.bf16.xpose.msra.mxu1 %v556_v3  ;;  %v1456_v11 = vld [vmem:[%s1768_s17 + $0x10] sm:$0xff]   ;;  %v1455_v12 = vld [vmem:[%s1768_s17 + $0x8] sm:$0xff]   ;;  %v1440_v17 = vld [vmem:[%s1768_s17] sm:$0xff]   ;;  %1535 = vrcp.f32 %v1823_v60  ;;  %v700_v38 = vand.u32 2147483647, %v1805_v50 }
  0x1e   : > { %1462 = vmatpush.bf16.xpose.msra.mxu2 %v556_v3  ;;  %1463 = vmatpush.bf16.xpose.msra.mxu3 %v556_v3  ;;  %v1449_v15 = vunpack.c.l.bf16 %v1456_v11  ;;  %v1445_v16 = vunpack.c.l.bf16 %v1455_v12  ;;  %v1441_v20 = vunpack.c.l.bf16 %v1440_v17  ;;  %v1450_v23 = vunpack.c.h.bf16 %v1456_v11  ;;  %v1457_v37 = vld [vmem:[%s1768_s17 + $0x18] sm:$0xff]   ;;  %s1210_s17 = scalar_lea.sflag [#allocation3], %s372_s14 }
  0x1f   : > { %v1446_v24 = vunpack.c.h.bf16 %v1455_v12  ;;  %v1442_v31 = vunpack.c.h.bf16 %v1440_v17  ;;  %v1454_v42 = vunpack.c.h.bf16 %v1457_v37  ;;  %v1801_v46 = vpop.eup %1527  ;;  %v1453_v48 = vunpack.c.l.bf16 %v1457_v37  ;;  %v1857_v12 = vld [vmem:[%s1780_s26 + $0x38] sm:$0xff]  ;;  %v1865_v17 = vld [vmem:[%s1780_s26 + $0x30] sm:$0xff] }
  0x20   : > { %v610_v21 = vmul.f32 %v1449_v15, %v594_v9  ;;  %v608_v22 = vmul.f32 %v1445_v16, %v592_v10  ;;  %v606_v26 = vmul.f32 %v1441_v20, %v590_v14  ;;  %v611_v33 = vmul.f32 %v1450_v23, %v595_v18  ;;  %v1820_v59 = vpop.eup %1529 }
  0x21   : > { %v609_v34 = vmul.f32 %v1446_v24, %v593_v19  ;;  %v607_v39 = vmul.f32 %v1442_v31, %v591_v32  ;;  %v613_v51 = vmul.f32 %v1454_v42, %v597_v43  ;;  %v647_v53 = vmul.f32 %v1801_v46, %v1784_v27  ;;  %v1829_v63 = vpop.eup %1531 }
  0x22   : > { %v626_v28 = vsel %vm524_vm0, %v610_v21, 0.0  ;;  %v620_v29 = vsel %vm524_vm0, %v608_v22, 0.0  ;;  %v614_v30 = vsel %vm524_vm0, %v606_v26, 0.0  ;;  %v629_v40 = vsel %vm524_vm0, %v611_v33, 0.0  ;;  %v1839_v3 = vpop.eup %1533 }
  0x23   : > { %627 = vadd.xlane.f32.xlu2 %v626_v28  ;;  %621 = vadd.xlane.f32.xlu1 %v620_v29  ;;  %v623_v41 = vsel %vm524_vm0, %v609_v34, 0.0  ;;  %v617_v47 = vsel %vm524_vm0, %v607_v39, 0.0  ;;  %v612_v55 = vmul.f32 %v1453_v48, %v596_v49  ;;  %v635_v56 = vsel %vm524_vm0, %v613_v51, 0.0  ;;  %v1861_v14 = vpop.eup %1535 }
  0x24   : > { %615 = vadd.xlane.f32.xlu0 %v614_v30  ;;  %v648_v58 = vsub.f32 1.0, %v647_v53  ;;  %v677_v2 = vmul.f32 %v1820_v59, %v1799_v45  ;;  %1537 = vrcp.f32 %v1827_v62  ;;  %vm652_vm2 = vweird.f32 %v1801_v46 }
  0x25   : > { %563 = vmatpush.bf16.xpose.msra.mxu0 %v553_v5  ;;  %1464 = vmatpush.bf16.xpose.msra.mxu1 %v553_v5  ;;  %v632_v61 = vsel %vm524_vm0, %v612_v55, 0.0  ;;  %vm1852_vm3 = vmor %vm651_vm1, %vm652_vm2  ;;  %v662_v13 = vmul.f32 %v1839_v3, %v1815_v54  ;;  %v538_v15 = vsel %vm524_vm0, %v1430_v4, 0  ;;  %v658_v20 = vor.u32 1.1754944e-38, %v657_v7 }
  0x26   : > { %1465 = vmatpush.bf16.xpose.msra.mxu2 %v553_v5  ;;  %1466 = vmatpush.bf16.xpose.msra.mxu3 %v553_v5  ;;  %v649_v1 = vmul.f32 %v1801_v46, %v648_v58  ;;  %v692_v5 = vmul.f32 %v1829_v63, %v1805_v50  ;;  %v678_v10 = vsub.f32 1.0, %v677_v2  ;;  %vm682_vm6 = vweird.f32 %v1820_v59  ;;  %v1426_v58 = vld [vmem:[%s1757_s10] sm:$0xff] }
  0x27   : > { %1539 = vrcp.f32 %v1857_v12  ;;  %v663_v23 = vsub.f32 1.0, %v662_v13  ;;  %v722_v24 = vmul.f32 %v1861_v14, %v1823_v60  ;;  %vm667_vm8 = vweird.f32 %v1839_v3  ;;  %vm1907_vm12 = vmor %vm681_vm5, %vm682_vm6 }
  0x28   : > { %v650_v9 = vadd.f32 %v1801_v46, %v649_v1  ;;  %v693_v16 = vsub.f32 1.0, %v692_v5  ;;  %v679_v22 = vmul.f32 %v1820_v59, %v678_v10  ;;  %1541 = vrcp.f32 %v1865_v17  ;;  %vm1899_vm11 = vmor %vm666_vm7, %vm667_vm8 }
  0x29   : > { %v664_v28 = vmul.f32 %v1839_v3, %v663_v23  ;;  %v672_v29 = vand.u32 2147483648, %v1815_v54  ;;  %v685_v31 = vand.u32 2147483647, %v1799_v45  ;;  %v687_v32 = vand.u32 2147483648, %v1799_v45 }
  0x2a   : > { %v1867_v18 = vpop.eup %1537  ;;  %v654_v21 = vsel %vm1852_vm3, %v1801_v46, %v650_v9  ;;  %v670_v33 = vand.u32 2147483647, %v1815_v54  ;;  %v680_v34 = vadd.f32 %v1820_v59, %v679_v22  ;;  %vm697_vm10 = vweird.f32 %v1829_v63 }
  0x2b   : > { %630 = vadd.xlane.f32.xlu2 %v629_v40  ;;  %624 = vadd.xlane.f32.xlu1 %v623_v41  ;;  %v707_v26 = vmul.f32 %v1867_v18, %v1827_v62  ;;  %v659_v30 = vsel %vm1869_vm4, %v658_v20, %v654_v21  ;;  %v665_v35 = vadd.f32 %v1839_v3, %v664_v28  ;;  %v702_v39 = vand.u32 2147483648, %v1805_v50  ;;  %vm1922_vm13 = vmor %vm696_vm9, %vm697_vm10 }
  0x2c   : > { %618 = vadd.xlane.f32.xlu0 %v617_v47  ;;  %v723_v40 = vsub.f32 1.0, %v722_v24  ;;  %vm671_vm14 = vcmp.eq.f32.partialorder %v670_v33, 8.507059e+37  ;;  %v684_v49 = vsel %vm1907_vm12, %v1820_v59, %v680_v34  ;;  %vm1932_vm15 = vcmp.eq.f32.partialorder %v685_v31, 8.507059e+37 }
  0x2d   : > { %564 = vmatpush.bf16.xpose.msra.mxu0 %v550_v25  ;;  %1467 = vmatpush.bf16.xpose.msra.mxu1 %v550_v25  ;;  %v1913_v41 = vpop.eup %1539  ;;  %v708_v43 = vsub.f32 1.0, %v707_v26  ;;  %v669_v48 = vsel %vm1899_vm11, %v1839_v3, %v665_v35  ;;  %v688_v52 = vor.u32 1.1754944e-38, %v687_v32  ;;  %vm1936_vm1 = vcmp.eq.f32.partialorder %v700_v38, 8.507059e+37  ;;  %v1428_v3 = vld [vmem:[%s1757_s10 + $0x10] sm:$0xff] }
  0x2e   : > { %1468 = vmatpush.bf16.xpose.msra.mxu2 %v550_v25  ;;  %1469 = vmatpush.bf16.xpose.msra.mxu3 %v550_v25  ;;  %v694_v25 = vmul.f32 %v1829_v63, %v693_v16  ;;  %v1916_v46 = vpop.eup %1541  ;;  %v703_v55 = vor.u32 1.1754944e-38, %v702_v39  ;;  %vm726_vm2 = vweird.f32 %v1823_v60  ;;  %vm727_vm3 = vweird.f32 %v1861_v14 }
  0x2f   : > { %v709_v0 = vmul.f32 %v1867_v18, %v708_v43  ;;  %v737_v1 = vmul.f32 %v1916_v46, %v1865_v17  ;;  %v730_v4 = vand.u32 2147483647, %v1823_v60  ;;  %v689_v5 = vsel %vm1932_vm15, %v688_v52, %v684_v49  ;;  %vm1969_vm6 = vmor %vm726_vm2, %vm727_vm3 }
  0x30   : > { %v695_v42 = vadd.f32 %v1829_v63, %v694_v25  ;;  %v732_v7 = vand.u32 2147483648, %v1823_v60  ;;  %vm711_vm4 = vweird.f32 %v1827_v62  ;;  %vm712_vm5 = vweird.f32 %v1867_v18 }
  0x31   : > { %v717_v9 = vand.u32 2147483648, %v1827_v62  ;;  %v710_v13 = vadd.f32 %v1867_v18, %v709_v0  ;;  %v738_v16 = vsub.f32 1.0, %v737_v1  ;;  %vm1978_vm7 = vmor %vm711_vm4, %vm712_vm5  ;;  %vm731_vm8 = vcmp.eq.f32.partialorder %v730_v4, 8.507059e+37 }
  0x32   : > { %v699_v59 = vsel %vm1922_vm13, %v1829_v63, %v695_v42  ;;  %v733_v20 = vor.u32 1.1754944e-38, %v732_v7  ;;  %vm756_vm10 = vweird.f32 %v1857_v12  ;;  %v762_v28 = vand.u32 2147483648, %v1857_v12 }
  0x33   : > { %636 = vadd.xlane.f32.xlu1 %v635_v56  ;;  %v724_v56 = vmul.f32 %v1861_v14, %v723_v40  ;;  %v704_v63 = vsel %vm1936_vm1, %v703_v55, %v699_v59  ;;  %v718_v22 = vor.u32 1.1754944e-38, %v717_v9  ;;  %v714_v24 = vsel %vm1978_vm7, %v1867_v18, %v710_v13 }
  0x34   : > { %633 = vadd.xlane.f32.xlu0 %v632_v61  ;;  %v1427_v61 = vld [vmem:[%s1757_s10 + $0x8] sm:$0xff]  ;;  %v739_v25 = vmul.f32 %v1916_v46, %v738_v16  ;;  %vm741_vm11 = vweird.f32 %v1865_v17  ;;  %vm742_vm12 = vweird.f32 %v1916_v46  ;;  %v747_v18 = vand.u32 2147483648, %v1865_v17  ;;  %s1411_s10 = sshll.u32 %s1714_s25, 6  ;;  %s1222_s25 = sshll.u32 %s2155_s9, 4  ;;  %s1223_s25 = int_to_ptr.vmem [resolvable:$true] %s1222_s25 }
  0x35   : > { %565 = vmatpush.bf16.xpose.msra.mxu0 %v547_v44  ;;  %1470 = vmatpush.bf16.xpose.msra.mxu1 %v547_v44  ;;  %v745_v32 = vand.u32 2147483647, %v1865_v17  ;;  %v763_v33 = vor.u32 1.1754944e-38, %v762_v28  ;;  %v2025_v53 = vstv %s1411_s10  ;;  %s1221_s15 = scalar_lea.hbm %s2252_s6, %s1411_s10 }
  0x36   : > { %1471 = vmatpush.bf16.xpose.msra.mxu2 %v547_v44  ;;  %1472 = vmatpush.bf16.xpose.msra.mxu3 %v547_v44  ;;  %v673_v44 = vor.u32 1.1754944e-38, %v672_v29  ;;  %v740_v31 = vadd.f32 %v1916_v46, %v739_v25  ;;  %v748_v35 = vor.u32 1.1754944e-38, %v747_v18  ;;  %s1224_s16 = sshll.u32 %s1221_s15, 4  ;;  %s2203_s16 = int_to_ptr.hbm [resolvable:$true] %s1224_s16 }
  0x37   : > { %vm746_vm1 = vcmp.eq.f32.partialorder %v745_v32, 8.507059e+37  ;;  %s1605_s10 = sshra.s32 %s2203_s16, 4  ;;  %s1606_s10 = int_to_ptr.hbm [resolvable:$true] %s1605_s10 }
  0x38   : > { %v674_v2 = vsel %vm671_vm14, %v673_v44, %v669_v48  ;;  %vm743_vm14 = vmor %vm741_vm11, %vm742_vm12  ;;  %s1607_s18 = scalar_lea.hbm %s1606_s10, 64  ;;  %p1612_p3 = scmp.lt.s32.totalorder %s1606_s10, %s2252_s6 }
  0x39   : > { %v744_v36 = vsel %vm743_vm14, %v1916_v46, %v740_v31  ;;  %v831_v46 = vlaneseq  ;;  %p1608_p0 = scmp.ne.s32.totalorder %s1606_s10, %s1607_s18  ;;  %p1613_p4 = scmp.lt.s32.totalorder %s1611_s20, %s1607_s18 }
  0x3a   : > { %v749_v38 = vsel %vm746_vm1, %v748_v35, %v744_v36 }
  0x3b   : > { %v2019_v51 = vshrl.u32 %v831_v46, 7  ;;  %p1609_p1 = pnand %p1608_p0, %p1731_p5  ;;  %p1614_p7 = por %p1613_p4, %p1612_p3 }
  0x3d   : > { %566 = vmatpush.bf16.xpose.msra.mxu0 %v544_v57  ;;  %1473 = vmatpush.bf16.xpose.msra.mxu1 %v544_v57  ;;  %v834_v52 = vadd.s32 16, %v2019_v51  ;;  %v841_v59 = vadd.s32 %v2025_v53, %v2019_v51  ;;  %v838_v7 = vadd.s32 48, %v2019_v51  ;;  %v833_v28 = vadd.s32 8, %v2019_v51  ;;  %p1610_p2 = pneg %p1609_p1 }
  0x3e   : > { %1474 = vmatpush.bf16.xpose.msra.mxu2 %v544_v57  ;;  %1475 = vmatpush.bf16.xpose.msra.mxu3 %v544_v57  ;;  %v752_v57 = vmul.f32 %v1913_v41, %v1857_v12 }
  0x3f   : > { %vm851_vm3 = vcmp.ge.s32.totalorder %v841_v59, 64  ;;  %p1615_p8 = pnand %p1614_p7, %p1610_p2 }
  0x40   : > { %v753_v10 = vsub.f32 1.0, %v752_v57 }
  0x42   : > { %v754_v23 = vmul.f32 %v1913_v41, %v753_v10 }
  0x43   : > { %768 = vperm.xlu2 %1524, %v659_v30   ;;  %v760_v30 = vand.u32 2147483647, %v1857_v12 }
  0x44   : > { %v755_v29 = vadd.f32 %v1913_v41, %v754_v23 }
  0x45   : > { %567 = vmatpush.bf16.xpose.msra.mxu0 %v541_v8  ;;  %1476 = vmatpush.bf16.xpose.msra.mxu1 %v541_v8  ;;  %vm761_vm15 = vcmp.eq.f32.partialorder %v760_v30, 8.507059e+37 }
  0x46   : > { %1477 = vmatpush.bf16.xpose.msra.mxu2 %v541_v8  ;;  %1478 = vmatpush.bf16.xpose.msra.mxu3 %v541_v8  ;;  %v725_v8 = vadd.f32 %v1861_v14, %v724_v56 }
  0x48   : > { %773 = vperm.xlu0 %1525, %v674_v2   ;;  %v729_v21 = vsel %vm1969_vm6, %v1861_v14, %v725_v8 }
  0x49   : > { %v734_v26 = vsel %vm731_vm8, %v733_v20, %v729_v21 }
  0x4b   : > { %783 = vperm.xlu2 %1524, %v704_v63  }
  0x4c   : > { %778 = vperm.xlu1 %1526, %v689_v5  }
  0x4d   : > { %568 = vmatpush.bf16.xpose.msra.mxu0 %v538_v15  ;;  %1479 = vmatpush.bf16.xpose.msra.mxu1 %v538_v15 }
  0x4e   : > { %1480 = vmatpush.bf16.xpose.msra.mxu2 %v538_v15  ;;  %1481 = vmatpush.bf16.xpose.msra.mxu3 %v538_v15  ;;  %v715_v15 = vand.u32 2147483647, %v1827_v62 }
  0x50   : > { %vm716_vm9 = vcmp.eq.f32.partialorder %v715_v15, 8.507059e+37  ;;  %v847_v15 = vadd.s32 %v2025_v53, %v838_v7 }
  0x51   : > { %v719_v14 = vsel %vm716_vm9, %v718_v22, %v714_v24  ;;  %v836_v24 = vadd.s32 32, %v2019_v51 }
  0x52   : > { %vm857_vm7 = vcmp.ge.s32.totalorder %v847_v15, 64 }
  0x53   : > { %788 = vperm.xlu2 %1524, %v719_v14   ;;  %v845_v35 = vadd.s32 %v2025_v53, %v836_v24 }
  0x54   : > { %1407 = vmatmul.msk.bf16.vlgmr.msra.gmra.mxu0 %vm524_vm0, %v1426_v58  ;;  %1408 = vmatmul.msk.bf16.vlgmr.msra.gmra.mxu1 %vm524_vm0, %v1427_v61  ;;  %v2029_v58 = vand.u32 127, %v831_v46  ;;  %v843_v61 = vadd.s32 %v2025_v53, %v834_v52 }
  0x55   : > { %1409 = vmatmul.msk.bf16.vlgmr.msra.gmra.mxu2 %vm524_vm0, %v1428_v3  ;;  %1410 = vmatmul.msk.bf16.vlgmr.msra.gmra.mxu3 %vm524_vm0, %v1429_v6  ;;  %vm757_vm0 = vweird.f32 %v1913_v41  ;;  %v1412_v6 = vadd.s32 4294967232, %v841_v59  ;;  %vm855_vm9 = vcmp.ge.s32.totalorder %v845_v35, 64 }
  0x56   : > { %vm758_vm13 = vmor %vm756_vm10, %vm757_vm0  ;;  %793 = vperm.xlu1 %1526, %v734_v26   ;;  %v1420_v4 = vadd.s32 4294967232, %v2029_v58  ;;  %v1414_v5 = vadd.s32 4294967232, %v843_v61  ;;  %vm875_vm2 = vcmp.ge.s32.totalorder %v2029_v58, 64  ;;  %vm853_vm4 = vcmp.ge.s32.totalorder %v843_v61, 64 }
  0x57   : > { %v759_v34 = vsel %vm758_vm13, %v1913_v41, %v755_v29  ;;  %v867_v13 = vsel %vm851_vm3, %v1412_v6, %v841_v59  ;;  %v1418_v26 = vadd.s32 4294967232, %v847_v15  ;;  %vm1056_vm3 = vcmp.eq.s32.totalorder %v2029_v58, 2 }
  0x58   : > { %v764_v37 = vsel %vm761_vm15, %v763_v33, %v759_v34  ;;  %v2041_v10 = vsel %vm875_vm2, %v1420_v4, %v2029_v58  ;;  %v869_v20 = vsel %vm853_vm4, %v1414_v5, %v843_v61  ;;  %v835_v33 = vadd.s32 24, %v2019_v51 }
  0x59   : > { %vm878_vm5 = vcmp.ne.s32.totalorder %v867_v13, %v2041_v10  ;;  %vm880_vm6 = vcmp.ne.s32.totalorder %v869_v20, %v2041_v10  ;;  %v839_v61 = vadd.s32 56, %v2019_v51  ;;  %vm1055_vm4 = vcmp.eq.s32.totalorder %v2029_v58, 1 }
  0x5b   : > { %798 = vperm.xlu2 %1524, %v749_v38   ;;  %v842_v38 = vadd.s32 %v2025_v53, %v833_v28 }
  0x5d   : > { %v1413_v59 = vadd.s32 4294967232, %v842_v38  ;;  %vm852_vm10 = vcmp.ge.s32.totalorder %v842_v38, 64 }
  0x5e   : > { %803 = vperm.xlu1 %1526, %v764_v37   ;;  %v873_v37 = vsel %vm857_vm7, %v1418_v26, %v847_v15 }
  0x5f   : > { %vm884_vm8 = vcmp.ne.s32.totalorder %v873_v37, %v2041_v10 }
  0x96   : > { %v2003_v39 = vpop.xlane.xlu2 %627  ;;  %v2007_v42 = vpop.xlane.xlu1 %621 }
  0x97   : > { %v2009_v44 = vpop.xlane.xlu0 %615 }
  0x9e   : > { %v2005_v40 = vpop.xlane.xlu2 %630  ;;  %v2011_v41 = vpop.xlane.xlu1 %624 }
  0x9f   : > { %v2015_v48 = vpop.xlane.xlu0 %618 }
  0xa6   : > { %v769_v43 = vpop.permute.xlu2 %768  ;;  %v2017_v49 = vpop.xlane.xlu1 %636 }
  0xa7   : > { %v2027_v57 = vpop.xlane.xlu0 %633 }
  0xae   : > { %v2013_v47 = vpop.permute.xlu2 %783 }
  0xb6   : > { %v789_v55 = vpop.permute.xlu2 %788 }
  0xba   : > { %v774_v11 = vpop.permute.xlu0 %773 }
  0xbe   : > { %v779_v56 = vpop.permute.xlu1 %778  ;;  %v799_v9 = vpop.permute.xlu2 %798 }
  0xc8   : > { %v794_v16 = vpop.permute.xlu1 %793 }
  0xd1   : > { %v2034_v0 = vpop.f32.mrf.mxu0  ;;  %v575_v1 = vpop.f32.mrf.mxu1 }
  0xd2   : > { %v806_v2 = vmul.f32 %v769_v43, %v2034_v0  ;;  %v808_v3 = vmul.f32 %v779_v56, %v575_v1  ;;  %v804_v56 = vpop.permute.xlu1 %803 }
  0xd4   : > { %v814_v63 = vmul.f32 1.442695, %v806_v2  ;;  %v818_v8 = vmul.f32 1.442695, %v808_v3  ;;  %v1416_v2 = vadd.s32 4294967232, %v845_v35 }
  0xd6   : > { %1543 = vpow2.f32 %v814_v63  ;;  %v871_v13 = vsel %vm855_vm9, %v1416_v2, %v845_v35 }
  0xd7   : > { %1545 = vpow2.f32 %v818_v8  ;;  %v837_v8 = vadd.s32 40, %v2019_v51  ;;  %vm882_vm12 = vcmp.ne.s32.totalorder %v871_v13, %v2041_v10 }
  0xd8   : > { %v2044_v19 = vpop.f32.mrf.mxu2  ;;  %v2046_v21 = vpop.f32.mrf.mxu3 }
  0xd9   : > { %v2048_v22 = vpop.f32.mrf.mxu0  ;;  %v812_v23 = vmul.f32 %v799_v9, %v2046_v21  ;;  %v810_v25 = vmul.f32 %v789_v55, %v2044_v19  ;;  %v2057_v32 = vpop.f32.mrf.mxu1  ;;  %v844_v55 = vadd.s32 %v2025_v53, %v835_v33  ;;  %v848_v9 = vadd.s32 %v2025_v53, %v839_v61 }
  0xda   : > { %v807_v30 = vmul.f32 %v774_v11, %v2048_v22  ;;  %v809_v46 = vmul.f32 %v2013_v47, %v2057_v32  ;;  %v868_v11 = vsel %vm852_vm10, %v1413_v59, %v842_v38 }
  0xdb   : > { %v826_v29 = vmul.f32 1.442695, %v812_v23  ;;  %v822_v36 = vmul.f32 1.442695, %v810_v25  ;;  %v1415_v15 = vadd.s32 4294967232, %v844_v55  ;;  %vm854_vm0 = vcmp.ge.s32.totalorder %v844_v55, 64 }
  0xdc   : > { %v1544_v14 = vpop.eup %1543  ;;  %v816_v43 = vmul.f32 1.442695, %v807_v30  ;;  %v820_v47 = vmul.f32 1.442695, %v809_v46  ;;  %vm879_vm11 = vcmp.ne.s32.totalorder %v868_v11, %v2041_v10  ;;  %v1419_v51 = vadd.s32 4294967232, %v848_v9  ;;  %v944_v46 = vld [vmem:[%s2089_s19 + $0x10] sm:$0xff] }
  0xdd   : > { %v1546_v18 = vpop.eup %1545  ;;  %v886_v31 = vsel %vm878_vm5, %v1544_v14, 0.0  ;;  %1547 = vpow2.f32 %v826_v29  ;;  %v870_v25 = vsel %vm854_vm0, %v1415_v15, %v844_v55  ;;  %vm858_vm13 = vcmp.ge.s32.totalorder %v848_v9, 64  ;;  %v982_v11 = vld [vmem:[%s2098_s28] sm:$0xff] }
  0xde   : > { %v888_v34 = vsel %vm880_vm6, %v1546_v18, 0.0  ;;  %894 = vadd.xlane.f32.xlu0 %v886_v31  ;;  %1549 = vpow2.f32 %v822_v36  ;;  %v910_v63 = vmul.f32 %v886_v31, %v2034_v0  ;;  %v846_v0 = vadd.s32 %v2025_v53, %v837_v8 }
  0xdf   : > { %898 = vadd.xlane.f32.xlu1 %v888_v34  ;;  %1551 = vpow2.f32 %v816_v43  ;;  %v912_v5 = vmul.f32 %v888_v34, %v575_v1  ;;  %vm881_vm14 = vcmp.ne.s32.totalorder %v870_v25, %v2041_v10  ;;  %v874_v18 = vsel %vm858_vm13, %v1419_v51, %v848_v9 }
  0xe0   : > { %v2064_v52 = vpop.f32.mrf.mxu3  ;;  %v582_v6 = vpop.f32.mrf.mxu2  ;;  %1553 = vpow2.f32 %v820_v47  ;;  %v1417_v30 = vadd.s32 4294967232, %v846_v0  ;;  %vm856_vm15 = vcmp.ge.s32.totalorder %v846_v0, 64  ;;  %vm885_vm1 = vcmp.ne.s32.totalorder %v874_v18, %v2041_v10 }
  0xe1   : > { %v813_v4 = vmul.f32 %v804_v56, %v2064_v52  ;;  %v811_v20 = vmul.f32 %v794_v16, %v582_v6  ;;  %vm1054_vm5 = vcmp.eq.s32.totalorder %v2029_v58, 0 }
  0xe2   : > { %v872_v33 = vsel %vm856_vm15, %v1417_v30, %v846_v0 }
  0xe3   : > { %v1548_v3 = vpop.eup %1547  ;;  %v828_v23 = vmul.f32 1.442695, %v813_v4  ;;  %v824_v26 = vmul.f32 1.442695, %v811_v20  ;;  %vm883_vm2 = vcmp.ne.s32.totalorder %v872_v33, %v2041_v10  ;;  %v942_v10 = vld [vmem:[%s2089_s19] sm:$0xff] }
  0xe4   : > { %v892_v7 = vsel %vm884_vm8, %v1548_v3, 0.0  ;;  %v1550_v1 = vpop.eup %1549  ;;  %v950_v56 = vmul.f32 0.2, %v942_v10 }
  0xe5   : > { %906 = vadd.xlane.f32.xlu2 %v892_v7  ;;  %v1552_v24 = vpop.eup %1551  ;;  %1555 = vpow2.f32 %v828_v23  ;;  %v916_v14 = vmul.f32 %v892_v7, %v2046_v21  ;;  %v890_v16 = vsel %vm882_vm12, %v1550_v1, 0.0  ;;  %v946_v1 = vld [vmem:[%s2089_s19 + $0x20] sm:$0xff] }
  0xe6   : > { %922 = vadd.xlane.f32.xlu0 %v912_v5  ;;  %v887_v28 = vsel %vm879_vm11, %v1552_v24, 0.0  ;;  %v1554_v29 = vpop.eup %1553  ;;  %1557 = vpow2.f32 %v824_v26  ;;  %v914_v38 = vmul.f32 %v890_v16, %v2044_v19  ;;  %v948_v5 = vld [vmem:[%s2089_s19 + $0x30] sm:$0xff]  ;;  %v954_v26 = vmul.f32 0.2, %v946_v1 }
  0xe7   : > { %918 = vadd.xlane.f32.xlu1 %v910_v63  ;;  %v889_v31 = vsel %vm881_vm14, %v1554_v29, 0.0  ;;  %v911_v43 = vmul.f32 %v887_v28, %v2048_v22  ;;  %v952_v22 = vmul.f32 0.2, %v944_v46  ;;  %v956_v7 = vmul.f32 0.2, %v948_v5  ;;  %v943_v29 = vld [vmem:[%s2089_s19 + $0x8] sm:$0xff] }
  0xe8   : > { %v913_v34 = vmul.f32 %v889_v31, %v2057_v32 }
  0xeb   : > { %v1556_v53 = vpop.eup %1555 }
  0xec   : > { %v893_v35 = vsel %vm885_vm1, %v1556_v53, 0.0  ;;  %v1558_v21 = vpop.eup %1557  ;;  %v945_v53 = vld [vmem:[%s2089_s19 + $0x18] sm:$0xff] }
  0xed   : > { %896 = vadd.xlane.f32.xlu2 %v887_v28  ;;  %v891_v36 = vsel %vm883_vm2, %v1558_v21, 0.0  ;;  %v917_v32 = vmul.f32 %v893_v35, %v2064_v52  ;;  %v953_v21 = vmul.f32 0.2, %v945_v53 }
  0xee   : > { %902 = vadd.xlane.f32.xlu0 %v890_v16  ;;  %v915_v37 = vmul.f32 %v891_v36, %v582_v6 }
  0xef   : > { %930 = vadd.xlane.f32.xlu1 %v916_v14 }
  0xf5   : > { %900 = vadd.xlane.f32.xlu2 %v889_v31  ;;  %v951_v31 = vmul.f32 0.2, %v943_v29 }
  0xf6   : > { %908 = vadd.xlane.f32.xlu0 %v893_v35 }
  0xf7   : > { %924 = vadd.xlane.f32.xlu1 %v913_v34 }
  0xfd   : > { %926 = vadd.xlane.f32.xlu2 %v914_v38 }
  0xfe   : > { %928 = vadd.xlane.f32.xlu0 %v915_v37 }
  0xff   : > { %904 = vadd.xlane.f32.xlu1 %v891_v36 }
 0x105   : > { %920 = vadd.xlane.f32.xlu2 %v911_v43 }
 0x10d   : > { %932 = vadd.xlane.f32.xlu2 %v917_v32 }
 0x151   : > { %v895_v19 = vpop.xlane.xlu0 %894 }
 0x152   : > { %v899_v55 = vpop.xlane.xlu1 %898  ;;  %v934_v61 = vmul.f32 0.007936508, %v895_v19  ;;  %v947_v19 = vld [vmem:[%s2089_s19 + $0x28] sm:$0xff] }
 0x153   : > { %v936_v59 = vmul.f32 0.007936508, %v899_v55 }
 0x154   : > { %v958_v2 = vmul.f32 0.8, %v934_v61  ;;  %v984_v61 = vld [vmem:[%s2098_s28 + $0x10] sm:$0xff] }
 0x155   : > { %v960_v52 = vmul.f32 0.8, %v936_v59 }
 0x156   : > { %v966_v3 = vadd.f32 %v958_v2, %v950_v56 }
 0x157   : > { %v968_v4 = vadd.f32 %v960_v52, %v952_v22  ;;  %v986_v52 = vld [vmem:[%s2098_s28 + $0x20] sm:$0xff] }
 0x158   : > { %1559 = vrcp.f32 %v966_v3  ;;  %1107 = vperm.xlu0 %1525, %v966_v3   ;;  %v907_v47 = vpop.xlane.xlu2 %906 }
 0x159   : > { %1117 = vperm.xlu1 %1526, %v968_v4   ;;  %v2100_v6 = vpop.xlane.xlu0 %922  ;;  %v940_v63 = vmul.f32 0.007936508, %v907_v47  ;;  %1561 = vlog2.f32 %v968_v4 }
 0x15a   : > { %v919_v8 = vpop.xlane.xlu1 %918  ;;  %1563 = vlog2.f32 %v966_v3 }
 0x15b   : > { %v964_v9 = vmul.f32 0.8, %v940_v63  ;;  %v998_v23 = vmul.f32 0.007936508, %v919_v8  ;;  %1565 = vrcp.f32 %v968_v4  ;;  %v955_v4 = vmul.f32 0.2, %v947_v19 }
 0x15d   : > { %v2103_v15 = vadd.f32 %v964_v9, %v956_v7 }
 0x15e   : > { %v1560_v13 = vpop.eup %1559 }
 0x15f   : > { %v990_v20 = vmul.f32 %v1560_v13, %v982_v11  ;;  %v1562_v34 = vpop.eup %1561 }
 0x160   : > { %1137 = vperm.xlu0 %1525, %v2103_v15   ;;  %v897_v0 = vpop.xlane.xlu2 %896  ;;  %v1027_v43 = vmul.f32 0.6931472, %v1562_v34 }
 0x161   : > { %v1006_v24 = vmul.f32 %v998_v23, %v990_v20  ;;  %v903_v51 = vpop.xlane.xlu0 %902  ;;  %v935_v30 = vmul.f32 0.007936508, %v897_v0  ;;  %v1000_v20 = vmul.f32 0.007936508, %v2100_v6 }
 0x162   : > { %v2107_v25 = vpop.xlane.xlu1 %930  ;;  %v938_v28 = vmul.f32 0.007936508, %v903_v51  ;;  %v1040_v55 = vadd.f32 6.0, %v1027_v43  ;;  %v949_v51 = vld [vmem:[%s2089_s19 + $0x38] sm:$0xff] }
 0x163   : > { %v1014_v14 = vsub.f32 %v1006_v24, %v2009_v44  ;;  %v959_v35 = vmul.f32 0.8, %v935_v30  ;;  %v1564_v44 = vpop.eup %1563  ;;  %v957_v29 = vmul.f32 0.2, %v949_v51 }
 0x164   : > { %v962_v16 = vmul.f32 0.8, %v938_v28  ;;  %v1023_v46 = vmul.f32 0.6931472, %v1564_v44  ;;  %v1566_v56 = vpop.eup %1565  ;;  %v1048_v8 = vmul.f32 %v1040_v55, %v1799_v45  ;;  %v985_v44 = vld [vmem:[%s2098_s28 + $0x18] sm:$0xff] }
 0x165   : > { %1155 = vperm.xlu1 %1526, %v1014_v14   ;;  %v967_v32 = vadd.f32 %v959_v35, %v951_v31  ;;  %v992_v7 = vmul.f32 %v1566_v56, %v984_v61 }
 0x166   : > { %v970_v18 = vadd.f32 %v962_v16, %v954_v26  ;;  %v1038_v59 = vadd.f32 6.0, %v1023_v46 }
 0x167   : > { %v1008_v0 = vmul.f32 %v1000_v20, %v992_v7  ;;  %v988_v20 = vld [vmem:[%s2098_s28 + $0x30] sm:$0xff] }
 0x168   : > { %1127 = vperm.xlu2 %1524, %v970_v18   ;;  %v901_v33 = vpop.xlane.xlu2 %900  ;;  %1567 = vrcp.f32 %v970_v18  ;;  %v1046_v13 = vmul.f32 %v1038_v59, %v1784_v27 }
 0x169   : > { %v937_v36 = vmul.f32 0.007936508, %v901_v33  ;;  %1569 = vlog2.f32 %v970_v18  ;;  %v909_v23 = vpop.xlane.xlu0 %908  ;;  %v1016_v27 = vsub.f32 %v1008_v0, %v2007_v42 }
 0x16a   : > { %v2112_v37 = vpop.xlane.xlu1 %924  ;;  %v941_v26 = vmul.f32 0.007936508, %v909_v23 }
 0x16b   : > { %v961_v38 = vmul.f32 0.8, %v937_v36  ;;  %v1001_v55 = vmul.f32 0.007936508, %v2112_v37 }
 0x16c   : > { %v965_v6 = vmul.f32 0.8, %v941_v26  ;;  %v1004_v26 = vmul.f32 0.007936508, %v2107_v25 }
 0x16d   : > { %v969_v10 = vadd.f32 %v961_v38, %v953_v21 }
 0x16e   : > { %v1568_v2 = vpop.eup %1567  ;;  %v973_v33 = vadd.f32 %v965_v6, %v957_v29 }
 0x16f   : > { %1122 = vperm.xlu0 %1525, %v969_v10   ;;  %v1570_v47 = vpop.eup %1569  ;;  %1571 = vlog2.f32 %v969_v10  ;;  %v994_v9 = vmul.f32 %v1568_v2, %v986_v52  ;;  %v987_v52 = vld [vmem:[%s2098_s28 + $0x28] sm:$0xff] }
 0x170   : > { %1112 = vperm.xlu2 %1524, %v967_v32   ;;  %v927_v3 = vpop.xlane.xlu2 %926  ;;  %1573 = vlog2.f32 %v967_v32  ;;  %v1031_v24 = vmul.f32 0.6931472, %v1570_v47 }
 0x171   : > { %v1002_v11 = vmul.f32 0.007936508, %v927_v3  ;;  %1575 = vlog2.f32 %v2103_v15 }
 0x172   : > { %v905_v22 = vpop.xlane.xlu1 %904  ;;  %v1042_v16 = vadd.f32 6.0, %v1031_v24  ;;  %1577 = vrcp.f32 %v969_v10 }
 0x173   : > { %v939_v5 = vmul.f32 0.007936508, %v905_v22  ;;  %v1010_v28 = vmul.f32 %v1002_v11, %v994_v9  ;;  %1579 = vrcp.f32 %v967_v32 }
 0x174   : > { %v1050_v53 = vmul.f32 %v1042_v16, %v1827_v62 }
 0x175   : > { %v963_v63 = vmul.f32 0.8, %v939_v5  ;;  %v1572_v14 = vpop.eup %1571  ;;  %v1018_v30 = vsub.f32 %v1010_v28, %v2003_v39  ;;  %v983_v39 = vld [vmem:[%s2098_s28 + $0x8] sm:$0xff] }
 0x176   : > { %v1574_v45 = vpop.eup %1573  ;;  %v1029_v18 = vmul.f32 0.6931472, %v1572_v14 }
 0x177   : > { %v971_v1 = vadd.f32 %v963_v63, %v955_v4  ;;  %1059 = vperm.xlu0 %1525, %v1046_v13   ;;  %v1025_v31 = vmul.f32 0.6931472, %v1574_v45  ;;  %v1576_v35 = vpop.eup %1575 }
 0x178   : > { %1069 = vperm.xlu2 %1524, %v1048_v8   ;;  %v1041_v34 = vadd.f32 6.0, %v1029_v18  ;;  %v921_v21 = vpop.xlane.xlu2 %920  ;;  %v1578_v42 = vpop.eup %1577  ;;  %v1035_v32 = vmul.f32 0.6931472, %v1576_v35 }
 0x179   : > { %1132 = vperm.xlu1 %1526, %v971_v1   ;;  %v1039_v36 = vadd.f32 6.0, %v1025_v31  ;;  %1581 = vrcp.f32 %v971_v1  ;;  %v1580_v38 = vpop.eup %1579  ;;  %v999_v43 = vmul.f32 0.007936508, %v921_v21  ;;  %v993_v10 = vmul.f32 %v1578_v42, %v985_v44 }
 0x17a   : > { %1583 = vlog2.f32 %v971_v1  ;;  %v1049_v62 = vmul.f32 %v1041_v34, %v1805_v50  ;;  %v991_v19 = vmul.f32 %v1580_v38, %v983_v39  ;;  %v1044_v22 = vadd.f32 6.0, %v1035_v32  ;;  %v929_v50 = vpop.xlane.xlu0 %928 }
 0x17b   : > { %1585 = vlog2.f32 %v973_v33  ;;  %v1047_v46 = vmul.f32 %v1039_v36, %v1815_v54  ;;  %v1009_v2 = vmul.f32 %v1001_v55, %v993_v10  ;;  %v1003_v63 = vmul.f32 0.007936508, %v929_v50 }
 0x17c   : > { %v1007_v61 = vmul.f32 %v999_v43, %v991_v19  ;;  %1587 = vrcp.f32 %v2103_v15  ;;  %v1052_v5 = vmul.f32 %v1044_v22, %v1865_v17 }
 0x17d   : > { %1589 = vrcp.f32 %v973_v33  ;;  %v1017_v37 = vsub.f32 %v1009_v2, %v2011_v41 }
 0x17e   : > { %v1015_v54 = vsub.f32 %v1007_v61, %v2015_v48  ;;  %v989_v48 = vld [vmem:[%s2098_s28 + $0x38] sm:$0xff] }
 0x17f   : > { %1175 = vperm.xlu0 %1525, %v1018_v30   ;;  %v1582_v56 = vpop.eup %1581 }
 0x180   : > { %1165 = vperm.xlu2 %1524, %v1016_v27   ;;  %v1584_v59 = vpop.eup %1583  ;;  %v995_v4 = vmul.f32 %v1582_v56, %v987_v52  ;;  %v933_v11 = vpop.xlane.xlu2 %932 }
 0x181   : > { %1079 = vperm.xlu1 %1526, %v1050_v53   ;;  %v1586_v3 = vpop.eup %1585  ;;  %v1033_v47 = vmul.f32 0.6931472, %v1584_v59  ;;  %v1005_v1 = vmul.f32 0.007936508, %v933_v11 }
 0x182   : > { %v1037_v7 = vmul.f32 0.6931472, %v1586_v3  ;;  %v1011_v8 = vmul.f32 %v1003_v63, %v995_v4  ;;  %v1588_v15 = vpop.eup %1587 }
 0x183   : > { %v1043_v9 = vadd.f32 6.0, %v1033_v47  ;;  %v1590_v23 = vpop.eup %1589  ;;  %v996_v0 = vmul.f32 %v1588_v15, %v988_v20 }
 0x184   : > { %v1045_v13 = vadd.f32 6.0, %v1037_v7  ;;  %v1019_v24 = vsub.f32 %v1011_v8, %v2005_v40  ;;  %v997_v51 = vmul.f32 %v1590_v23, %v989_v48 }
 0x185   : > { %v1051_v17 = vmul.f32 %v1043_v9, %v1823_v60  ;;  %v1012_v14 = vmul.f32 %v1004_v26, %v996_v0 }
 0x186   : > { %v1053_v41 = vmul.f32 %v1045_v13, %v1857_v12  ;;  %v1013_v28 = vmul.f32 %v1005_v1, %v997_v51 }
 0x187   : > { %1074 = vperm.xlu0 %1525, %v1049_v62   ;;  %v1020_v45 = vsub.f32 %v1012_v14, %v2027_v57 }
 0x188   : > { %1142 = vperm.xlu2 %1524, %v973_v33   ;;  %v1021_v16 = vsub.f32 %v1013_v28, %v2017_v49 }
 0x189   : > { %1064 = vperm.xlu1 %1526, %v1047_v46  }
 0x18f   : > { %1160 = vperm.xlu0 %1525, %v1015_v54  }
 0x190   : > { %1089 = vperm.xlu2 %1524, %v1052_v5  }
 0x191   : > { %1170 = vperm.xlu1 %1526, %v1017_v37  }
 0x197   : > { %1084 = vperm.xlu0 %1525, %v1051_v17  }
 0x198   : > { %1180 = vperm.xlu2 %1524, %v1019_v24  }
 0x199   : > { %1094 = vperm.xlu1 %1526, %v1053_v41  }
 0x19f   : > { %1190 = vperm.xlu0 %1525, %v1021_v16  }
 0x1a1   : > { %1185 = vperm.xlu1 %1526, %v1020_v45  }
 0x1c2   : > { %v1128_v60 = vpop.permute.xlu2 %1127 }
 0x1ca   : > { %v1113_v40 = vpop.permute.xlu2 %1112  ;;  %v1108_v29 = vpop.permute.xlu0 %1107 }
 0x1cb   : > { %v1118_v49 = vpop.permute.xlu1 %1117 }
 0x1d2   : > { %v1070_v12 = vpop.permute.xlu2 %1069  ;;  %v1138_v27 = vpop.permute.xlu0 %1137 }
 0x1d3   : > { %v1099_v25 = vsel %vm1056_vm3, %v1070_v12, 0.0 }
 0x1d4   : > { %v1147_v57 = vsel %vm1055_vm4, %v1118_v49, %v1099_v25 }
 0x1d7   : > { %v1156_v53 = vpop.permute.xlu1 %1155 }
 0x1da   : > { %v1166_v6 = vpop.permute.xlu2 %1165 }
 0x1db   : > { %v1195_v30 = vsel %vm1054_vm5, %v1166_v6, %v1147_v57 }
 0x1dc   : > { %1203 = vst [vmem:[%s2155_s9 + $0x10] sm:$0xff] %v1195_v30 }
 0x1e1   : > { %v1123_v18 = vpop.permute.xlu0 %1122 }
 0x1e2   : > { %v1143_v43 = vpop.permute.xlu2 %1142 }
 0x1e9   : > { %v1060_v31 = vpop.permute.xlu0 %1059 }
 0x1ea   : > { %v1097_v33 = vsel %vm1056_vm3, %v1060_v31, 0.0  ;;  %v1090_v19 = vpop.permute.xlu2 %1089 }
 0x1eb   : > { %v1133_v34 = vpop.permute.xlu1 %1132  ;;  %v1145_v35 = vsel %vm1055_vm4, %v1108_v29, %v1097_v33  ;;  %v1103_v37 = vsel %vm1056_vm3, %v1090_v19, 0.0 }
 0x1ec   : > { %v1193_v21 = vsel %vm1054_vm5, %v1156_v53, %v1145_v35  ;;  %v1151_v8 = vsel %vm1055_vm4, %v1138_v27, %v1103_v37 }
 0x1ed   : > { %1201 = vst [vmem:[%s2155_s9] sm:$0xff] %v1193_v21 }
 0x1f1   : > { %v1176_v36 = vpop.permute.xlu0 %1175 }
 0x1f2   : > { %v1181_v4 = vpop.permute.xlu2 %1180 }
 0x1f3   : > { %v1080_v42 = vpop.permute.xlu1 %1079 }
 0x1f4   : > { %v1101_v44 = vsel %vm1056_vm3, %v1080_v42, 0.0 }
 0x1f5   : > { %v1149_v38 = vsel %vm1055_vm4, %v1128_v60, %v1101_v44 }
 0x1f6   : > { %v1197_v39 = vsel %vm1054_vm5, %v1176_v36, %v1149_v38 }
 0x1f7   : > { %1205 = vst [vmem:[%s2155_s9 + $0x20] sm:$0xff] %v1197_v39 }
 0x1f9   : > { %v1075_v62 = vpop.permute.xlu0 %1074 }
 0x1fa   : > { %v1100_v46 = vsel %vm1056_vm3, %v1075_v62, 0.0 }
 0x1fb   : > { %v1065_v32 = vpop.permute.xlu1 %1064  ;;  %v1148_v61 = vsel %vm1055_vm4, %v1123_v18, %v1100_v46 }
 0x1fc   : > { %v1098_v10 = vsel %vm1056_vm3, %v1065_v32, 0.0 }
 0x1fd   : > { %v1146_v55 = vsel %vm1055_vm4, %v1113_v40, %v1098_v10 }
 0x201   : > { %v1161_v56 = vpop.permute.xlu0 %1160 }
 0x202   : > { %v1194_v22 = vsel %vm1054_vm5, %v1161_v56, %v1146_v55 }
 0x203   : > { %v1171_v59 = vpop.permute.xlu1 %1170  ;;  %1202 = vst [vmem:[%s2155_s9 + $0x8] sm:$0xff] %v1194_v22 }
 0x204   : > { %v1196_v2 = vsel %vm1054_vm5, %v1171_v59, %v1148_v61 }
 0x205   : > { %1204 = vst [vmem:[%s2155_s9 + $0x18] sm:$0xff] %v1196_v2 }
 0x209   : > { %v1085_v52 = vpop.permute.xlu0 %1084 }
 0x20a   : > { %v1102_v3 = vsel %vm1056_vm3, %v1085_v52, 0.0 }
 0x20b   : > { %v1095_v50 = vpop.permute.xlu1 %1094  ;;  %v1150_v54 = vsel %vm1055_vm4, %v1133_v34, %v1102_v3 }
 0x20c   : > { %v1198_v5 = vsel %vm1054_vm5, %v1181_v4, %v1150_v54  ;;  %v1104_v47 = vsel %vm1056_vm3, %v1095_v50, 0.0 }
 0x20d   : > { %1206 = vst [vmem:[%s2155_s9 + $0x28] sm:$0xff] %v1198_v5  ;;  %v1152_v7 = vsel %vm1055_vm4, %v1143_v43, %v1104_v47 }
 0x211   : > { %v1191_v63 = vpop.permute.xlu0 %1190 }
 0x212   : > { %v1200_v9 = vsel %vm1054_vm5, %v1191_v63, %v1152_v7 }
 0x213   : > { %v1186_v15 = vpop.permute.xlu1 %1185  ;;  %1208 = vst [vmem:[%s2155_s9 + $0x38] sm:$0xff] %v1200_v9 }
 0x214   : > { %v1199_v11 = vsel %vm1054_vm5, %v1186_v15, %v1151_v8 }
 0x215   : > { %1207 = vst [vmem:[%s2155_s9 + $0x30] sm:$0xff] %v1199_v11 }
 0x216   : > { %1618 = shalt.err (!%p1615_p8)
}
 0x217   : > { %s1656_s14 = smov 128   ;;  %s1657_s29 = smov 8  }
 0x218   : > { %1482 = dma.vmem_to_hbm [thread:$0]  (%p1731_p5), %s1223_s25, 1024, %s2203_s16, %s1210_s17, %s1656_s14, %s1656_s14, %s1657_s29  }
 0x219 PF: > { %p1488_p9 = scmp.ge.s32.totalorder %s1653_s24, 2  ;;  %s1239_s9 = sand.u32 1, %s1641_s21  }
 0x21a   : > { %s1240_s12 = scalar_lea.sflag [#allocation3], %s1239_s9 }
 0x21b   : > { %p1485_p10 = pnand %p1488_p9, %p1735_p6 }
 0x21d   : > { %p1486_p11 = pneg %p1485_p10 }
 0x21f   : > { %1636 = dma.done.wait (%p1486_p11), %s1240_s12, 1024  }
 0x220   : > { %1638 = vsyncadd (%p1486_p11), %s1240_s12, 4294966272  ;;  %p16_p12 = scmp.ge.s32.totalorder %s1718_s27, 4   ;;  %s2273_s21 = smov %s1645_s22 }
 0x221   : > { %s2274_s22 = smov %s1649_s23  ;;  %s2275_s23 = smov %s1729_s30 }
 0x222   : > { %s2276_s24 = smov %s1718_s27  ;;  %18 = sbr.rel (!%p16_p12) target bundleno = 3 (0x3), region = 91 }
 0x227   :  { %1246 = vsyncpa [#allocation3], 1 }
 0x228   :  { %1248 = vsyncpa [#allocation3 + $0x1], 1 }

</bundles_post_ra>
